<compile_context>
chip_gen: v6e
topology: v6e:2x2x1
jax: 0.10.0
libtpu: 0.0.40
codegen_flags: <defaults>
</compile_context>

<pallas_src>
import math

import jax
import jax.numpy as jnp
from jax.experimental import pallas as pl
from jax.experimental.pallas import tpu as pltpu

LANE = 128
SUBLANE = 8


def _round_up(n, m):
    return ((n + m - 1) // m) * m


# ---------------------------------------------------------------------------
# Kernel
# ---------------------------------------------------------------------------
def value_network_kernel(state_ref, w1_ref, b1_ref, w2_ref, b2_ref,
                         w3_ref, b3_ref, out_ref):
    # Layer 1: MXU matmul (f32 accumulate); bias + ReLU on the VPU in f32.
    h = jnp.dot(state_ref[...], w1_ref[...], preferred_element_type=jnp.float32)
    h = jnp.maximum(h + b1_ref[...], 0.0)
    # Layer 2: cast activations to the streaming dtype for the second MXU pass.
    h = jnp.dot(h.astype(w2_ref.dtype), w2_ref[...],
                preferred_element_type=jnp.float32)
    h = jnp.maximum(h + b2_ref[...], 0.0)
    # Layer 3 (value head, out_features == 1): VPU multiply + lane reduce,
    # scalar bias read from SMEM.  No N=1 MXU pass.
    v = jnp.sum(h * w3_ref[...], axis=-1, keepdims=True) + b3_ref[0]
    out_ref[...] = v.astype(out_ref.dtype)


# ---------------------------------------------------------------------------
# One-time parameter preparation (hoisted out of the forward pass)
# ---------------------------------------------------------------------------
def prepare_value_network_params(params, *, use_bf16=True):
    """Pad hidden dim to lane width, cast matmul weights, once per param set.

    Zero padding keeps the math exact: padded hidden units see zero weight
    columns/rows and stay at relu(0 + 0) = 0 through every layer, and the
    padded w3 entries are zero so they do not contribute to the value.
    """
    w1, b1 = params["w1"], params["b1"]
    w2, b2 = params["w2"], params["b2"]
    w3, b3 = params["w3"], params["b3"]
    num_inputs, hidden = w1.shape
    hid_pad = _round_up(hidden, LANE)
    compute_dtype = jnp.bfloat16 if use_bf16 else jnp.float32

    w1p = (jnp.zeros((num_inputs, hid_pad), jnp.float32)
           .at[:, :hidden].set(w1).astype(compute_dtype))
    w2p = (jnp.zeros((hid_pad, hid_pad), jnp.float32)
           .at[:hidden, :hidden].set(w2).astype(compute_dtype))
    b1p = jnp.zeros((1, hid_pad), jnp.float32).at[:, :hidden].set(
        b1.reshape(1, hidden))
    b2p = jnp.zeros((1, hid_pad), jnp.float32).at[:, :hidden].set(
        b2.reshape(1, hidden))
    w3p = jnp.zeros((1, hid_pad), jnp.float32).at[:, :hidden].set(
        w3.reshape(1, hidden))
    b3s = b3.reshape((1,)).astype(jnp.float32)  # scalar final bias -> SMEM

    return {
        "w1p": w1p, "b1p": b1p, "w2p": w2p, "b2p": b2p, "w3p": w3p, "b3s": b3s,
        "num_inputs": int(num_inputs), "hidden": int(hidden),
        "hid_pad": int(hid_pad), "compute_dtype": compute_dtype,
    }


def _choose_tb(batch, tb, sub=SUBLANE):
    """Pick the per-step batch tile: multiple of `sub`, >=2 grid steps when
    the batch allows it (v7x megacore), never (much) larger than the batch."""
    tb = max(sub, (tb // sub) * sub)
    if batch > 2 * sub:
        tb = min(tb, _round_up(pl.cdiv(batch, 2), sub))
    tb = min(tb, _round_up(batch, sub))
    return tb


# ---------------------------------------------------------------------------
# Forward pass
# ---------------------------------------------------------------------------
def value_network_forward(state, prepared, *, tb=1024):
    """state: [B, num_inputs]; prepared: output of prepare_value_network_params.

    Returns [B, 1] float32 value estimates.
    """
    B, num_inputs = state.shape
    assert num_inputs == prepared["num_inputs"]
    hid_pad = prepared["hid_pad"]
    compute_dtype = prepared["compute_dtype"]
    w1p, b1p = prepared["w1p"], prepared["b1p"]
    w2p, b2p = prepared["w2p"], prepared["b2p"]
    w3p, b3s = prepared["w3p"], prepared["b3s"]

    # Cast the streamed operand only (no padded copy, no batch padding).
    # NOTE: on the bf16 path this reduces input precision of the state itself;
    # accumulation stays f32 inside the kernel.
    state = state.astype(compute_dtype)

    TB = _choose_tb(B, tb)
    grid = (pl.cdiv(B, TB),)  # partial last block is masked by Pallas

    # VMEM budget: double-buffered state/out tiles + (conservatively
    # double-buffered) resident weights, with headroom.  Floor of 16 MiB is
    # within every generation's scoped default; cap at v7x's 64 MiB physical.
    itemsize = jnp.dtype(compute_dtype).itemsize
    tile_bytes = TB * num_inputs * itemsize + TB * 4
    weight_bytes = sum(int(x.size) * x.dtype.itemsize
                       for x in (w1p, b1p, w2p, b2p, w3p))
    vmem_limit = int(min(64 * 1024 * 1024,
                         max(16 * 1024 * 1024,
                             4 * (2 * tile_bytes + 2 * weight_bytes))))

    hidden = prepared["hidden"]
    flops = 2 * B * (num_inputs * hidden + hidden * hidden + hidden)
    bytes_accessed = (int(state.size) * itemsize + weight_bytes
                      + b3s.size * 4 + B * 4)
    cost = pl.CostEstimate(flops=flops, transcendentals=0,
                           bytes_accessed=bytes_accessed)

    out = pl.pallas_call(
        value_network_kernel,
        out_shape=jax.ShapeDtypeStruct((B, 1), jnp.float32),
        grid=grid,
        in_specs=[
            # Streamed over the batch grid (double-buffered by the pipeline).
            # Last dim = num_inputs equals the full array dim -> legal block.
            pl.BlockSpec((TB, num_inputs), lambda i: (i, 0)),
            # Tiny weights/biases stay VMEM-resident (constant block index).
            pl.BlockSpec((num_inputs, hid_pad), lambda i: (0, 0)),
            pl.BlockSpec((1, hid_pad), lambda i: (0, 0)),
            pl.BlockSpec((hid_pad, hid_pad), lambda i: (0, 0)),
            pl.BlockSpec((1, hid_pad), lambda i: (0, 0)),
            pl.BlockSpec((1, hid_pad), lambda i: (0, 0)),
            # Scalar final bias in SMEM (no padded VMEM tile / extra DMA).
            pl.BlockSpec(memory_space=pltpu.MemorySpace.SMEM),
        ],
        out_specs=pl.BlockSpec((TB, 1), lambda i: (i, 0)),
        compiler_params=pltpu.CompilerParams(
            dimension_semantics=("parallel",),
            vmem_limit_bytes=vmem_limit,
        ),
        cost_estimate=cost,
    )(state, w1p, b1p, w2p, b2p, w3p, b3s)

    return out


# ---------------------------------------------------------------------------
# Init + pure-JAX reference (mirrors the PyTorch module)
# ---------------------------------------------------------------------------
def xavier_uniform(key, fan_in, fan_out, gain=1.0):
    # torch.nn.init.xavier_uniform_ on weight of shape [out, in]:
    #   bound = gain * sqrt(6 / (fan_in + fan_out))
    bound = gain * math.sqrt(6.0 / (fan_in + fan_out))
    # Returned in [in, out] layout (transposed vs PyTorch storage).
    return jax.random.uniform(key, (fan_in, fan_out), jnp.float32,
                              minval=-bound, maxval=bound)


def init_value_network_params(key, num_inputs, hidden_dim):
    k1, k2, k3 = jax.random.split(key, 3)
    return {
        "w1": xavier_uniform(k1, num_inputs, hidden_dim),
        "b1": jnp.zeros((1, hidden_dim), jnp.float32),
        "w2": xavier_uniform(k2, hidden_dim, hidden_dim),
        "b2": jnp.zeros((1, hidden_dim), jnp.float32),
        "w3": xavier_uniform(k3, hidden_dim, 1),
        "b3": jnp.zeros((1, 1), jnp.float32),
    }


def value_network_ref(state, params):
    h = jnp.maximum(state @ params["w1"] + params["b1"], 0.0)
    h = jnp.maximum(h @ params["w2"] + params["b2"], 0.0)
    return h @ params["w3"] + params["b3"]


if __name__ == "__main__":
    key = jax.random.PRNGKey(0)
    k_params, k_state, k_state2 = jax.random.split(key, 3)

    batch = 8
    num_inputs = 16
    hidden_dim = 32

    params = init_value_network_params(k_params, num_inputs, hidden_dim)
    prep_f32 = prepare_value_network_params(params, use_bf16=False)
    prep_bf16 = prepare_value_network_params(params, use_bf16=True)   # default path

    # Small-shape check: exact f32 parity with the reference.
    state = jax.random.normal(k_state, (batch, num_inputs), jnp.float32)
    ref = value_network_ref(state, params)
    out = jax.block_until_ready(value_network_forward(state, prep_f32))
    assert out.shape == (batch, 1), out.shape
    assert jnp.allclose(out, ref, atol=1e-4, rtol=1e-4), "f32 mismatch vs reference"

    # Default bf16-streaming path on the small shape (loose tolerance).
    out_bf = jax.block_until_ready(value_network_forward(state, prep_bf16))
    assert out_bf.shape == (batch, 1), out_bf.shape
    assert jnp.allclose(out_bf, ref, atol=1e-1, rtol=1e-1), \
        "bf16 path diverged from f32 reference (small batch)"

    # Multi-tile grid with a partial last block (520 = 2*256 + 8), f32 exact.
    big_batch = 520
    state_big = jax.random.normal(k_state2, (big_batch, num_inputs), jnp.float32)
    ref_big = value_network_ref(state_big, params)
    out_big = jax.block_until_ready(
        value_network_forward(state_big, prep_f32, tb=256))
    assert out_big.shape == (big_batch, 1), out_big.shape
    assert jnp.allclose(out_big, ref_big, atol=1e-4, rtol=1e-4), \
        "f32 multi-tile mismatch vs reference"

    # Multi-tile bf16 default path.
    out_big_bf = jax.block_until_ready(
        value_network_forward(state_big, prep_bf16, tb=256))
    assert out_big_bf.shape == (big_batch, 1), out_big_bf.shape
    assert jnp.allclose(out_big_bf, ref_big, atol=1e-1, rtol=1e-1), \
        "bf16 multi-tile path diverged from f32 reference"

    print("KERNEL_OK")
</pallas_src>

<mosaic_0001>
module attributes {stable_mosaic.version = 11 : i64} {
  func.func @value_network_kernel(%arg0: i32, %arg1: memref<8x16xf32, #tpu.memory_space<vmem>>, %arg2: memref<16x128xf32, #tpu.memory_space<vmem>>, %arg3: memref<1x128xf32, #tpu.memory_space<vmem>>, %arg4: memref<128x128xf32, #tpu.memory_space<vmem>>, %arg5: memref<1x128xf32, #tpu.memory_space<vmem>>, %arg6: memref<1x128xf32, #tpu.memory_space<vmem>>, %arg7: memref<1xf32, #tpu.memory_space<smem>>, %arg8: memref<8x1xf32, #tpu.memory_space<vmem>>) attributes {dimension_semantics = [#tpu.dimension_semantics<parallel>], iteration_bounds = array<i64: 1>, scalar_prefetch = 0 : i64, scratch_operands = 0 : i64, tpu.core_type = #tpu.core_type<tc>, window_params = [{transform_indices = @transform_0, window_bounds = array<i64: 8, 16>}, {pipeline_mode = #tpu.pipeline_mode<synchronous>, transform_indices = @transform_1, window_bounds = array<i64: 16, 128>}, {pipeline_mode = #tpu.pipeline_mode<synchronous>, transform_indices = @transform_2, window_bounds = array<i64: 1, 128>}, {pipeline_mode = #tpu.pipeline_mode<synchronous>, transform_indices = @transform_3, window_bounds = array<i64: 128, 128>}, {pipeline_mode = #tpu.pipeline_mode<synchronous>, transform_indices = @transform_4, window_bounds = array<i64: 1, 128>}, {pipeline_mode = #tpu.pipeline_mode<synchronous>, transform_indices = @transform_5, window_bounds = array<i64: 1, 128>}, {transform_indices = @transform_6, window_bounds = array<i64: 1>}, {transform_indices = @transform_7, window_bounds = array<i64: 8, 1>}]} {
    %c0 = arith.constant 0 : index
    %c0_0 = arith.constant 0 : index
    %0 = vector.load %arg1[%c0, %c0_0] : memref<8x16xf32, #tpu.memory_space<vmem>>, vector<8x16xf32>
    %c0_1 = arith.constant 0 : index
    %c0_2 = arith.constant 0 : index
    %1 = vector.load %arg2[%c0_1, %c0_2] : memref<16x128xf32, #tpu.memory_space<vmem>>, vector<16x128xf32>
    %cst = arith.constant dense<0.000000e+00> : vector<8x128xf32>
    %2 = tpu.matmul %0, %1, %cst {dimension_numbers = #tpu.dot_dimension_numbers<[1], [0], [0], [1], [0, 0, 1, 1], [], []>} : vector<8x16xf32>, vector<16x128xf32>, vector<8x128xf32> -> vector<8x128xf32>
    %c0_3 = arith.constant 0 : index
    %c0_4 = arith.constant 0 : index
    %3 = vector.load %arg3[%c0_3, %c0_4] : memref<1x128xf32, #tpu.memory_space<vmem>>, vector<1x128xf32>
    %4 = vector.broadcast %3 : vector<1x128xf32> to vector<8x128xf32>
    %5 = arith.addf %2, %4 : vector<8x128xf32>
    %cst_5 = arith.constant 0.000000e+00 : f32
    %6 = vector.broadcast %cst_5 : f32 to vector<8x128xf32>
    %7 = arith.maximumf %5, %6 : vector<8x128xf32>
    %c0_6 = arith.constant 0 : index
    %c0_7 = arith.constant 0 : index
    %8 = vector.load %arg4[%c0_6, %c0_7] : memref<128x128xf32, #tpu.memory_space<vmem>>, vector<128x128xf32>
    %cst_8 = arith.constant dense<0.000000e+00> : vector<8x128xf32>
    %9 = tpu.matmul %7, %8, %cst_8 {dimension_numbers = #tpu.dot_dimension_numbers<[1], [0], [0], [1], [0, 0, 1, 1], [], []>} : vector<8x128xf32>, vector<128x128xf32>, vector<8x128xf32> -> vector<8x128xf32>
    %c0_9 = arith.constant 0 : index
    %c0_10 = arith.constant 0 : index
    %10 = vector.load %arg5[%c0_9, %c0_10] : memref<1x128xf32, #tpu.memory_space<vmem>>, vector<1x128xf32>
    %11 = vector.broadcast %10 : vector<1x128xf32> to vector<8x128xf32>
    %12 = arith.addf %9, %11 : vector<8x128xf32>
    %cst_11 = arith.constant 0.000000e+00 : f32
    %13 = vector.broadcast %cst_11 : f32 to vector<8x128xf32>
    %14 = arith.maximumf %12, %13 : vector<8x128xf32>
    %c0_12 = arith.constant 0 : index
    %c0_13 = arith.constant 0 : index
    %15 = vector.load %arg6[%c0_12, %c0_13] : memref<1x128xf32, #tpu.memory_space<vmem>>, vector<1x128xf32>
    %16 = vector.broadcast %15 : vector<1x128xf32> to vector<8x128xf32>
    %17 = arith.mulf %14, %16 : vector<8x128xf32>
    %cst_14 = arith.constant dense<0.000000e+00> : vector<8xf32>
    %18 = vector.multi_reduction <add>, %17, %cst_14 [1] : vector<8x128xf32> to vector<8xf32>
    %19 = vector.shape_cast %18 : vector<8xf32> to vector<8x1xf32>
    %c0_15 = arith.constant 0 : index
    %20 = memref.load %arg7[%c0_15] : memref<1xf32, #tpu.memory_space<smem>>
    %21 = vector.broadcast %20 : f32 to vector<8x1xf32>
    %22 = arith.addf %19, %21 : vector<8x1xf32>
    %c0_16 = arith.constant 0 : index
    %c0_17 = arith.constant 0 : index
    %23 = vector.load %arg8[%c0_16, %c0_17] : memref<8x1xf32, #tpu.memory_space<vmem>>, vector<8x1xf32>
    tpu.vector_store %arg8[%c0_16, %c0_17], %22 {strides = array<i32>} : memref<8x1xf32, #tpu.memory_space<vmem>>, vector<8x1xf32>,
    return
  }
  func.func @transform_0(%arg0: i32) -> (i32, i32) {
    %c0_i32 = arith.constant 0 : i32
    %c0_i32_0 = arith.constant 0 : i32
    return %arg0, %c0_i32 : i32, i32
  }
  func.func @transform_1(%arg0: i32) -> (i32, i32) {
    %c0_i32 = arith.constant 0 : i32
    %c0_i32_0 = arith.constant 0 : i32
    %c0_i32_1 = arith.constant 0 : i32
    return %c0_i32, %c0_i32_0 : i32, i32
  }
  func.func @transform_2(%arg0: i32) -> (i32, i32) {
    %c0_i32 = arith.constant 0 : i32
    %c0_i32_0 = arith.constant 0 : i32
    %c0_i32_1 = arith.constant 0 : i32
    return %c0_i32, %c0_i32_0 : i32, i32
  }
  func.func @transform_3(%arg0: i32) -> (i32, i32) {
    %c0_i32 = arith.constant 0 : i32
    %c0_i32_0 = arith.constant 0 : i32
    %c0_i32_1 = arith.constant 0 : i32
    return %c0_i32, %c0_i32_0 : i32, i32
  }
  func.func @transform_4(%arg0: i32) -> (i32, i32) {
    %c0_i32 = arith.constant 0 : i32
    %c0_i32_0 = arith.constant 0 : i32
    %c0_i32_1 = arith.constant 0 : i32
    return %c0_i32, %c0_i32_0 : i32, i32
  }
  func.func @transform_5(%arg0: i32) -> (i32, i32) {
    %c0_i32 = arith.constant 0 : i32
    %c0_i32_0 = arith.constant 0 : i32
    %c0_i32_1 = arith.constant 0 : i32
    return %c0_i32, %c0_i32_0 : i32, i32
  }
  func.func @transform_6(%arg0: i32) -> i32 {
    %c0_i32 = arith.constant 0 : i32
    %c0_i32_0 = arith.constant 0 : i32
    return %c0_i32 : i32
  }
  func.func @transform_7(%arg0: i32) -> (i32, i32) {
    %c0_i32 = arith.constant 0 : i32
    %c0_i32_0 = arith.constant 0 : i32
    return %arg0, %c0_i32 : i32, i32
  }
}

</mosaic_0001>

<bundles_post_ra>
// kernel: tpu_custom_call.1
= control target key start
LH: loop header
LB: loop body
LE: loop exit
PB: predicated region body
PF: predicated region fallthrough
CT: control target
= control target key end

     0   :  { %13 = vsyncpa [#allocation4], 0  ;;  %s474_s0 = inlined_call_operand.hbm [shape: f32[8,16], index: 0, kind: input, shape index: {}]   ;;  %s475_s1 = inlined_call_operand.hbm [shape: f32[16,128], index: 1, kind: input, shape index: {}]   ;;  %s476_s2 = inlined_call_operand.vmem [shape: f32[1,128], index: 2, kind: input, shape index: {}]   ;;  %s477_s3 = inlined_call_operand.hbm [shape: f32[128,128], index: 3, kind: input, shape index: {}]   ;;  %s478_s4 = inlined_call_operand.vmem [shape: f32[1,128], index: 4, kind: input, shape index: {}]   ;;  %s479_s5 = inlined_call_operand.vmem [shape: f32[1,128], index: 5, kind: input, shape index: {}]   ;;  %s480_s6 = inlined_call_operand.<no memory space> [shape: f32[1], index: 6, kind: input, shape index: {}]   ;;  %s481_s7 = inlined_call_operand.vmem [shape: f32[8,1], index: 7, kind: output, shape index: {}]  }
   0x1   :  { %14 = vsyncpa [#allocation6], 0  ;;  %s403_s24 = smov [#allocation5]  }
   0x2   :  { %s30_s25 = sshll.u32 %s403_s24, 4  ;;  %s31_s25 = int_to_ptr.vmem [resolvable:$true] %s30_s25 }
   0x3   :  { %s347_s26 = scalar_lea.vmem %s31_s25, 256  ;;  %p352_p1 = scmp.lt.s32.totalorder %s31_s25, %s31_s25 }
   0x4   :  { %p348_p0 = scmp.ne.s32.totalorder %s31_s25, %s347_s26  ;;  %p353_p2 = scmp.lt.s32.totalorder %s347_s26, %s347_s26 }
   0x6   :  { %p354_p3 = por %p353_p2, %p352_p1 }
   0x8   :  { %p355_p4 = pnand %p354_p3, %p348_p0 }
   0xa   :  { %358 = shalt.err (!%p355_p4)
}
   0xb   :  { %s404_s27 = smov 128   ;;  %s405_s28 = smov 8  }
   0xc   :  { %36 = dma.hbm_to_vmem [thread:$0]  %s475_s1, 256, %s31_s25, [#allocation6], %s404_s27, %s404_s27, %s405_s28  }
   0xd   :  { %s406_s8 = smov [#allocation3]   ;;  %s407_s10 = smov [#allocation7]  }
   0xe   :  { %s21_s9 = sshll.u32 %s406_s8, 4  ;;  %s44_s11 = sshll.u32 %s407_s10, 4  ;;  %s22_s9 = int_to_ptr.vmem [resolvable:$true] %s21_s9  ;;  %s45_s11 = int_to_ptr.vmem [resolvable:$true] %s44_s11 }
   0xf   :  { %s367_s12 = scalar_lea.vmem %s22_s9, 128  ;;  %p372_p6 = scmp.lt.s32.totalorder %s22_s9, %s22_s9 }
  0x10   :  { %p368_p5 = scmp.ne.s32.totalorder %s22_s9, %s367_s12  ;;  %p373_p7 = scmp.lt.s32.totalorder %s367_s12, %s367_s12 }
  0x12   :  { %p374_p8 = por %p373_p7, %p372_p6 }
  0x14   :  { %p375_p9 = pnand %p374_p8, %p368_p5 }
  0x16   :  { %378 = shalt.err (!%p375_p9)
}
  0x17   :  { %24 = dma.hbm_to_vmem [thread:$0]  %s474_s0, 128, %s22_s9, [#allocation4]  }
  0x18   :  { %s387_s15 = scalar_lea.vmem %s45_s11, 2048  ;;  %p392_p11 = scmp.lt.s32.totalorder %s45_s11, %s45_s11 }
  0x19   :  { %p388_p10 = scmp.ne.s32.totalorder %s45_s11, %s387_s15  ;;  %p393_p12 = scmp.lt.s32.totalorder %s387_s15, %s387_s15 }
  0x1b   :  { %p394_p13 = por %p393_p12, %p392_p11 }
  0x1d   :  { %p395_p0 = pnand %p394_p13, %p388_p10 }
  0x1f   :  { %398 = shalt.err (!%p395_p0)
}
  0x20   :  { %50 = dma.hbm_to_vmem [thread:$0]  %s477_s3, 2048, %s45_s11, [#allocation6], %s404_s27, %s404_s27, %s405_s28  }
  0x21   :  { %399 = dma.done.wait [#allocation4], 128  }
  0x22   :  { %400 = vsyncadd [#allocation4], 4294967168 }
  0x23   :  { %401 = dma.done.wait [#allocation6], 2304  }
  0x24   :  { %402 = vsyncadd [#allocation6], 4294964992  ;;  %v408_v0 = vmov 0.0   ;;  %vm409_vm0 = vmmov 0   ;;  %v68_v1 = vld [vmem:[#allocation5 + $0x8] sm:$0xff]  ;;  %v67_v2 = vld [vmem:[#allocation5] sm:$0xff]  ;;  %v256_v32 = vstv %s480_s6 }
  0x25   :  { %290 = vmatprep.subr.mxu0 %v408_v0  ;;  %294 = vmatprep.mubr.msk.f32.mxu0 %vm409_vm0, %v408_v0  ;;  %v66_v3 = vld [vmem:[#allocation3] sm:$0xff]  ;;  %vm76_vm1 = vcmask 130048   ;;  %v166_v4 = vld [vmem:[#allocation7 + $0x78] sm:$0xff]  ;;  %v165_v5 = vld [vmem:[#allocation7 + $0x70] sm:$0xff]  ;;  %vm258_vm2 = vcmask 7168  }
  0x26   :  { %297 = vmatprep.subr.mxu1 %v408_v0  ;;  %329 = vmatprep.mubr.msk.f32.mxu1 %vm409_vm0, %v408_v0  ;;  %v164_v6 = vld [vmem:[#allocation7 + $0x68] sm:$0xff]  ;;  %v163_v7 = vld [vmem:[#allocation7 + $0x60] sm:$0xff]  ;;  %v162_v8 = vld [vmem:[#allocation7 + $0x58] sm:$0xff] }
  0x27   :  { %291 = vmatpush3.msra.mxu0 %v68_v1  ;;  %298 = vmatpush3.msra.mxu1 %v166_v4  ;;  %v161_v9 = vld [vmem:[#allocation7 + $0x50] sm:$0xff]  ;;  %v160_v10 = vld [vmem:[#allocation7 + $0x48] sm:$0xff]  ;;  %v159_v11 = vld [vmem:[#allocation7 + $0x40] sm:$0xff] }
  0x28   :  { %292 = vmatprep.subr.mxu0 %v408_v0  ;;  %299 = vmatprep.subr.mxu1 %v408_v0  ;;  %v158_v12 = vld [vmem:[#allocation7 + $0x38] sm:$0xff]  ;;  %v157_v13 = vld [vmem:[#allocation7 + $0x30] sm:$0xff]  ;;  %v156_v14 = vld [vmem:[#allocation7 + $0x28] sm:$0xff] }
  0x29   :  { %293 = vmatpush3.msra.mxu0 %v67_v2  ;;  %300 = vmatpush3.msra.mxu1 %v165_v5  ;;  %v155_v15 = vld [vmem:[#allocation7 + $0x20] sm:$0xff]  ;;  %v154_v16 = vld [vmem:[#allocation7 + $0x18] sm:$0xff]  ;;  %v153_v17 = vld [vmem:[#allocation7 + $0x10] sm:$0xff] }
  0x2a   :  { %295 = vmatmul.mubr.msk.f32.vlgmr.msra.gmra.mxu0 %vm76_vm1, %v66_v3  ;;  %301 = vmatprep.subr.mxu1 %v408_v0  ;;  %v152_v18 = vld [vmem:[#allocation7 + $0x8] sm:$0xff]  ;;  %v151_v19 = vld [vmem:[#allocation7] sm:$0xff] }
  0x2b   :  { %302 = vmatpush3.msra.mxu1 %v164_v6  ;;  %v266_v20 = vld [vmem:[%s476_s2] ss:$0 sm:$0xff] }
  0x2c   :  { %303 = vmatprep.subr.mxu1 %v408_v0  ;;  %v268_v25 = vld [vmem:[%s478_s4] ss:$0 sm:$0xff] }
  0x2d   :  { %304 = vmatpush3.msra.mxu1 %v163_v7  ;;  %v269_v29 = vld [vmem:[%s479_s5] ss:$0 sm:$0xff] }
  0x2e   :  { %305 = vmatprep.subr.mxu1 %v408_v0 }
  0x2f   :  { %306 = vmatpush3.msra.mxu1 %v162_v8 }
  0x30   :  { %307 = vmatprep.subr.mxu1 %v408_v0 }
  0x31   :  { %308 = vmatpush3.msra.mxu1 %v161_v9 }
  0x32   :  { %309 = vmatprep.subr.mxu1 %v408_v0 }
  0x33   :  { %310 = vmatpush3.msra.mxu1 %v160_v10 }
  0x34   :  { %311 = vmatprep.subr.mxu1 %v408_v0 }
  0x35   :  { %312 = vmatpush3.msra.mxu1 %v159_v11 }
  0x36   :  { %313 = vmatprep.subr.mxu1 %v408_v0 }
  0x37   :  { %314 = vmatpush3.msra.mxu1 %v158_v12 }
  0x38   :  { %315 = vmatprep.subr.mxu1 %v408_v0 }
  0x39   :  { %316 = vmatpush3.msra.mxu1 %v157_v13 }
  0x3a   :  { %317 = vmatprep.subr.mxu1 %v408_v0 }
  0x3b   :  { %318 = vmatpush3.msra.mxu1 %v156_v14 }
  0x3c   :  { %319 = vmatprep.subr.mxu1 %v408_v0 }
  0x3d   :  { %320 = vmatpush3.msra.mxu1 %v155_v15 }
  0x3e   :  { %321 = vmatprep.subr.mxu1 %v408_v0 }
  0x3f   :  { %322 = vmatpush3.msra.mxu1 %v154_v16 }
  0x40   :  { %323 = vmatprep.subr.mxu1 %v408_v0 }
  0x41   :  { %324 = vmatpush3.msra.mxu1 %v153_v17 }
  0x42   :  { %325 = vmatprep.subr.mxu1 %v408_v0 }
  0x43   :  { %326 = vmatpush3.msra.mxu1 %v152_v18 }
  0x44   :  { %327 = vmatprep.subr.mxu1 %v408_v0 }
  0x45   :  { %328 = vmatpush3.msra.mxu1 %v151_v19 }
  0xea   :  { %v146_v21 = vpop.f32.mrf.mxu0 }
  0xeb   :  { %v147_v22 = vadd.f32 %v266_v20, %v146_v21 }
  0xec   :  { %v296_v23 = vpop.f32.mrf.mxu0 }
  0xed   :  { %v150_v24 = vmax.f32 %v147_v22, 0.0 }
  0xef   :  { %330 = vmatmul.mubr.f32.vlgmr.msra.gmra.mxu1 %v150_v24 }
 0x1af   :  { %v240_v26 = vpop.f32.mrf.mxu1 }
 0x1b0   :  { %v241_v27 = vadd.f32 %v268_v25, %v240_v26 }
 0x1b1   :  { %v331_v28 = vpop.f32.mrf.mxu1 }
 0x1b2   :  { %v244_v30 = vmax.f32 %v241_v27, 0.0 }
 0x1b4   :  { %v252_v31 = vmul.f32 %v269_v29, %v244_v30 }
 0x1b6   :  { %253 = vadd.xlane.f32.xlu0 %v252_v31 }
 0x23f   :  { %v254_v33 = vpop.xlane.xlu0 %253 }
 0x240   :  { %v257_v34 = vadd.f32 %v256_v32, %v254_v33 }
 0x242   :  { %259 = vst.msk [vmem:[%s481_s7] sm:$0xff] %vm258_vm2, %v257_v34 }
 0x243   :  { %264 = vsyncpa [#allocation4], 1 }
 0x244   :  { %265 = vsyncpa [#allocation6], 1 }

</bundles_post_ra>
